<compile_context>
chip_gen: v6e
topology: v6e:2x2x1
jax: 0.10.0
libtpu: 0.0.40
codegen_flags: <defaults>
</compile_context>

<pallas_src>
import functools

import jax
import jax.numpy as jnp
from jax.experimental import pallas as pl
from jax.experimental.pallas import tpu as pltpu


_LANE = 128
_SMALL_ELEMS = 128 * 1024     # below this: one whole-array block (launch-bound)


def _round_up(x, m):
    return ((x + m - 1) // m) * m


def _round_down(x, m):
    return (x // m) * m


def _sublane_multiple(dtype):
    # Native sublane tiling: 8 rows for 32-bit, 16 for 16-bit, 32 for 8-bit.
    itemsize = jnp.dtype(dtype).itemsize
    return max(8, 32 // max(1, itemsize))


@functools.lru_cache(maxsize=1)
def _vmem_capacity_bytes():
    try:
        info = pltpu.get_tpu_info()
        cap = getattr(info, "vmem_capacity_bytes", None)
        if cap:
            return int(cap)
    except Exception:
        pass
    return None


def _vmem_limit_bytes():
    cap = _vmem_capacity_bytes()
    if cap is None:
        return 48 << 20                              # safe on v5e / v6e / v7x
    return int(min(64 << 20, (cap * 3) // 4))        # 64 MiB on 128-MiB parts, 48 MiB on v7x


def _block_elems():
    # ~2 MiB f32 per stream per block; bump to ~4 MiB where VMEM is plentiful.
    cap = _vmem_capacity_bytes()
    if cap is not None and cap >= (96 << 20):
        return 1 << 20
    return 1 << 19


def _pick_tiles(B, N, dtype, block_elems):
    """Pick a (tile_b, tile_n) block for the 2-D cdiv grid over [B, N]."""
    sub = _sublane_multiple(dtype)
    # Cap the lane dim so even an 8-row tile stays within the block budget.
    n_cap = max(_LANE, _round_down(block_elems // sub, _LANE))
    tile_n = min(_round_up(N, _LANE), n_cap)         # multiple of 128 (ragged edge masked)
    rows = max(sub, block_elems // tile_n)
    if B <= rows:
        tile_b = B                                    # equals full dim -> always legal
    else:
        tile_b = _round_down(rows, sub)               # multiple of sublane tile
    return tile_b, tile_n


def _make_kernels(a_coef, b_coef):
    """Trace-time-specialized kernels with fusion coefficients baked in."""
    a = float(a_coef)
    b = float(b_coef)

    def _fuse(recon, pred):
        if a == 1.0 and b == 1.0:                     # 'sum' folds to a single add
            return recon + pred
        return a * recon + b * pred

    def kernel_no_prompt(recon_ref, pred_ref, out_ref):
        out_ref[...] = _fuse(recon_ref[...], pred_ref[...]).astype(out_ref.dtype)

    def kernel_prompt(w_ref, recon_ref, pred_ref, prompt_ref, out_ref):
        w = w_ref[0]                                  # learnable scalar, from SMEM
        s = _fuse(recon_ref[...], pred_ref[...])
        out_ref[...] = (s * (1.0 + w * prompt_ref[...])).astype(out_ref.dtype)

    return kernel_no_prompt, kernel_prompt


def anomaly_scorer(recon_error, pred_error, prompt=None, *,
                   method="sum", alpha=0.5, use_prompt=False,
                   prompt_weight=1.0):
    """Pallas TPU implementation of AnomalyScorer.forward.

    recon_error, pred_error, prompt: [B, N] float32.  Returns [B, N] float32.
    prompt_weight may be a Python float or a (traced) JAX scalar/array.
    """
    B, N = recon_error.shape
    assert pred_error.shape == (B, N)
    dtype = recon_error.dtype

    if method == "sum":
        a_coef, b_coef = 1.0, 1.0
    elif method == "weighted":
        a_coef, b_coef = float(alpha), 1.0 - float(alpha)
    else:
        raise ValueError("Unsupported method")

    kernel_no_prompt, kernel_prompt = _make_kernels(a_coef, b_coef)

    use_p = bool(use_prompt) and (prompt is not None)
    if use_p:
        assert prompt.shape == (B, N)
        w = jnp.asarray(prompt_weight, dtype=jnp.float32).reshape(1)
        kernel = kernel_prompt
        smem_spec = pl.BlockSpec(memory_space=pltpu.MemorySpace.SMEM)
    else:
        kernel = kernel_no_prompt

    out_shape = jax.ShapeDtypeStruct((B, N), dtype)
    total = B * N

    # ---- tiny inputs: one whole-array block (block == full dims is always legal)
    if total <= _SMALL_ELEMS:
        full = pl.BlockSpec((B, N), lambda i: (0, 0))
        if use_p:
            in_specs = [smem_spec, full, full, full]
            inputs = (w, recon_error, pred_error, prompt)
        else:
            in_specs = [full, full]
            inputs = (recon_error, pred_error)
        return pl.pallas_call(
            kernel,
            out_shape=out_shape,
            grid=(1,),
            in_specs=in_specs,
            out_specs=full,
            compiler_params=pltpu.CompilerParams(
                dimension_semantics=("arbitrary",)),
        )(*inputs)

    # ---- large inputs: tile [B, N] directly; cdiv grid, ragged edges masked ----
    tile_b, tile_n = _pick_tiles(B, N, dtype, _block_elems())
    grid = (pl.cdiv(B, tile_b), pl.cdiv(N, tile_n))
    tile = pl.BlockSpec((tile_b, tile_n), lambda i, j: (i, j))
    # Note: pipeline_mode=pl.Buffered(3) on the input specs is a candidate
    # single-digit-% win; left at the default depth of 2 so the footprint stays
    # comfortably inside every generation's scoped VMEM limit.
    if use_p:
        in_specs = [smem_spec, tile, tile, tile]
        inputs = (w, recon_error, pred_error, prompt)
    else:
        in_specs = [tile, tile]
        inputs = (recon_error, pred_error)

    return pl.pallas_call(
        kernel,
        out_shape=out_shape,
        grid=grid,
        in_specs=in_specs,
        out_specs=tile,
        compiler_params=pltpu.CompilerParams(
            dimension_semantics=("parallel", "parallel"),
            vmem_limit_bytes=_vmem_limit_bytes()),
    )(*inputs)


if __name__ == "__main__":
    key = jax.random.PRNGKey(0)
    k1, k2, k3 = jax.random.split(key, 3)

    # Small shapes matching the module's [B, N] convention.
    B, N = 2, 256
    recon_error = jax.random.uniform(k1, (B, N), dtype=jnp.float32)
    pred_error = jax.random.uniform(k2, (B, N), dtype=jnp.float32)
    prompt = jax.random.uniform(k3, (B, N), dtype=jnp.float32)

    # nn.Parameter(torch.ones(1)) equivalent — passed as a (traced-friendly) array.
    prompt_weight = jnp.ones((1,), dtype=jnp.float32)

    # Case 1: default config (method='sum', use_prompt=False)
    out_sum = anomaly_scorer(recon_error, pred_error, method="sum", use_prompt=False)
    jax.block_until_ready(out_sum)
    assert jnp.allclose(out_sum, recon_error + pred_error, atol=1e-6), "sum mismatch"

    # Case 2: weighted fusion with prompt modulation (learnable-parameter array)
    alpha = 0.5
    out_w = anomaly_scorer(recon_error, pred_error, prompt,
                           method="weighted", alpha=alpha, use_prompt=True,
                           prompt_weight=prompt_weight)
    jax.block_until_ready(out_w)
    ref_w = (alpha * recon_error + (1 - alpha) * pred_error) * (1.0 + prompt_weight[0] * prompt)
    assert jnp.allclose(out_w, ref_w, atol=1e-6), "weighted+prompt mismatch"

    # Case 3: non-128-multiple N on the whole-array path
    r3 = jax.random.uniform(k1, (B, 250), dtype=jnp.float32)
    p3 = jax.random.uniform(k2, (B, 250), dtype=jnp.float32)
    out3 = anomaly_scorer(r3, p3, method="sum", use_prompt=False)
    jax.block_until_ready(out3)
    assert jnp.allclose(out3, r3 + p3, atol=1e-6), "odd-N mismatch"

    # Case 4: larger shape on the tiled path (no pad / slice in the wrapper)
    km1, km2, km3 = jax.random.split(jax.random.PRNGKey(1), 3)
    rm = jax.random.uniform(km1, (8, 131072), dtype=jnp.float32)
    pm = jax.random.uniform(km2, (8, 131072), dtype=jnp.float32)
    qm = jax.random.uniform(km3, (8, 131072), dtype=jnp.float32)
    out_m = anomaly_scorer(rm, pm, qm, method="weighted", alpha=0.3,
                           use_prompt=True, prompt_weight=0.75)
    jax.block_until_ready(out_m)
    ref_m = (0.3 * rm + 0.7 * pm) * (1.0 + 0.75 * qm)
    assert jnp.allclose(out_m, ref_m, atol=1e-5), "tiled path mismatch"

    # Case 5: tiled path with a ragged (non-128-multiple) lane dimension
    kr1, kr2 = jax.random.split(jax.random.PRNGKey(2), 2)
    rr = jax.random.uniform(kr1, (10, 40000), dtype=jnp.float32)
    pr = jax.random.uniform(kr2, (10, 40000), dtype=jnp.float32)
    out_r = anomaly_scorer(rr, pr, method="sum", use_prompt=False)
    jax.block_until_ready(out_r)
    assert jnp.allclose(out_r, rr + pr, atol=1e-6), "ragged-lane tiled mismatch"

    print("KERNEL_OK")
</pallas_src>

<mosaic_0001>
module attributes {stable_mosaic.version = 11 : i64} {
  func.func @kernel_no_prompt(%arg0: i32, %arg1: memref<2x256xf32, #tpu.memory_space<vmem>>, %arg2: memref<2x256xf32, #tpu.memory_space<vmem>>, %arg3: memref<2x256xf32, #tpu.memory_space<vmem>>) attributes {dimension_semantics = [#tpu.dimension_semantics<arbitrary>], iteration_bounds = array<i64: 1>, scalar_prefetch = 0 : i64, scratch_operands = 0 : i64, tpu.core_type = #tpu.core_type<tc>, window_params = [{pipeline_mode = #tpu.pipeline_mode<synchronous>, transform_indices = @transform_0, window_bounds = array<i64: 2, 256>}, {pipeline_mode = #tpu.pipeline_mode<synchronous>, transform_indices = @transform_1, window_bounds = array<i64: 2, 256>}, {pipeline_mode = #tpu.pipeline_mode<synchronous>, transform_indices = @transform_2, window_bounds = array<i64: 2, 256>}]} {
    %c0 = arith.constant 0 : index
    %c0_0 = arith.constant 0 : index
    %0 = vector.load %arg1[%c0, %c0_0] : memref<2x256xf32, #tpu.memory_space<vmem>>, vector<2x256xf32>
    %c0_1 = arith.constant 0 : index
    %c0_2 = arith.constant 0 : index
    %1 = vector.load %arg2[%c0_1, %c0_2] : memref<2x256xf32, #tpu.memory_space<vmem>>, vector<2x256xf32>
    %2 = arith.addf %0, %1 : vector<2x256xf32>
    %c0_3 = arith.constant 0 : index
    %c0_4 = arith.constant 0 : index
    %3 = vector.load %arg3[%c0_3, %c0_4] : memref<2x256xf32, #tpu.memory_space<vmem>>, vector<2x256xf32>
    tpu.vector_store %arg3[%c0_3, %c0_4], %2 {strides = array<i32>} : memref<2x256xf32, #tpu.memory_space<vmem>>, vector<2x256xf32>,
    return
  }
  func.func @transform_0(%arg0: i32) -> (i32, i32) {
    %c0_i32 = arith.constant 0 : i32
    %c0_i32_0 = arith.constant 0 : i32
    %c0_i32_1 = arith.constant 0 : i32
    return %c0_i32, %c0_i32_0 : i32, i32
  }
  func.func @transform_1(%arg0: i32) -> (i32, i32) {
    %c0_i32 = arith.constant 0 : i32
    %c0_i32_0 = arith.constant 0 : i32
    %c0_i32_1 = arith.constant 0 : i32
    return %c0_i32, %c0_i32_0 : i32, i32
  }
  func.func @transform_2(%arg0: i32) -> (i32, i32) {
    %c0_i32 = arith.constant 0 : i32
    %c0_i32_0 = arith.constant 0 : i32
    %c0_i32_1 = arith.constant 0 : i32
    return %c0_i32, %c0_i32_0 : i32, i32
  }
}

</mosaic_0001>

<bundles_post_ra>
// kernel: tpu_custom_call.1
= control target key start
LH: loop header
LB: loop body
LE: loop exit
PB: predicated region body
PF: predicated region fallthrough
CT: control target
= control target key end

     0   :  { %7 = vsyncpa [#allocation3], 0  ;;  %s152_s0 = inlined_call_operand.hbm [shape: f32[2,256], index: 0, kind: input, shape index: {}]   ;;  %s153_s1 = inlined_call_operand.hbm [shape: f32[2,256], index: 1, kind: input, shape index: {}]   ;;  %s154_s2 = inlined_call_operand.hbm [shape: f32[2,256], index: 2, kind: output, shape index: {}]  }
   0x1   :  { %8 = vsyncpa [#allocation6], 0 }
   0x2   :  { %9 = vsyncpa [#allocation4], 0  ;;  %s125_s9 = smov [#allocation2]   ;;  %s126_s11 = smov [#allocation5]  }
   0x3   :  { %s16_s10 = sshll.u32 %s125_s9, 4  ;;  %s26_s12 = sshll.u32 %s126_s11, 4  ;;  %s17_s10 = int_to_ptr.vmem [resolvable:$true] %s16_s10  ;;  %s27_s12 = int_to_ptr.vmem [resolvable:$true] %s26_s12 }
   0x4   :  { %s67_s13 = scalar_lea.vmem %s17_s10, 64  ;;  %p72_p1 = scmp.lt.s32.totalorder %s17_s10, %s17_s10 }
   0x5   :  { %p68_p0 = scmp.ne.s32.totalorder %s17_s10, %s67_s13  ;;  %p73_p2 = scmp.lt.s32.totalorder %s67_s13, %s67_s13 }
   0x7   :  { %p74_p3 = por %p73_p2, %p72_p1 }
   0x9   :  { %p75_p4 = pnand %p74_p3, %p68_p0 }
   0xb   :  { %78 = shalt.err (!%p75_p4)
}
   0xc   :  { %19 = dma.hbm_to_vmem [thread:$0]  %s152_s0, 64, %s17_s10, [#allocation3]  }
   0xd   :  { %s87_s16 = scalar_lea.vmem %s27_s12, 64  ;;  %p92_p6 = scmp.lt.s32.totalorder %s27_s12, %s27_s12 }
   0xe   :  { %p88_p5 = scmp.ne.s32.totalorder %s27_s12, %s87_s16  ;;  %p93_p7 = scmp.lt.s32.totalorder %s87_s16, %s87_s16 }
  0x10   :  { %p94_p8 = por %p93_p7, %p92_p6 }
  0x12   :  { %p95_p9 = pnand %p94_p8, %p88_p5 }
  0x14   :  { %98 = shalt.err (!%p95_p9)
}
  0x15   :  { %29 = dma.hbm_to_vmem [thread:$0]  %s153_s1, 64, %s27_s12, [#allocation6]  }
  0x16   :  { %119 = dma.done.wait [#allocation3], 64  }
  0x17   :  { %120 = vsyncadd [#allocation3], 4294967232 }
  0x18   :  { %121 = dma.done.wait [#allocation6], 64  }
  0x19   :  { %122 = vsyncadd [#allocation6], 4294967232  ;;  %s127_s19 = smov [#allocation7]   ;;  %v36_v0 = vld [vmem:[#allocation2] sm:$0xf] }
  0x1a   :  { %s46_s20 = sshll.u32 %s127_s19, 4  ;;  %v37_v1 = vld [vmem:[#allocation5] sm:$0xf]  ;;  %s47_s20 = int_to_ptr.vmem [resolvable:$true] %s46_s20 }
  0x1b   :  { %v38_v2 = vadd.f32 %v37_v1, %v36_v0  ;;  %s99_s0 = scalar_lea.vmem %s47_s20, 64  ;;  %p104_p11 = scmp.lt.s32.totalorder %s47_s20, %s47_s20 }
  0x1c   :  { %p100_p10 = scmp.ne.s32.totalorder %s47_s20, %s99_s0  ;;  %p105_p12 = scmp.lt.s32.totalorder %s99_s0, %s99_s0 }
  0x1d   :  { %39 = vst [vmem:[#allocation7] sm:$0xf] %v38_v2 }
  0x1e   :  { %p106_p13 = por %p105_p12, %p104_p11 }
  0x20   :  { %p107_p0 = pnand %p106_p13, %p100_p10 }
  0x22   :  { %110 = shalt.err (!%p107_p0)
}
  0x23   :  { %49 = dma.vmem_to_hbm [thread:$0]  %s47_s20, 64, %s154_s2, [#allocation4]  }
  0x24   :  { %123 = dma.done.wait [#allocation4], 64  }
  0x25   :  { %124 = vsyncadd [#allocation4], 4294967232 }
  0x26   :  { %53 = vsyncpa [#allocation3], 1 }
  0x27   :  { %54 = vsyncpa [#allocation6], 1 }
  0x28   :  { %55 = vsyncpa [#allocation4], 1 }

</bundles_post_ra>
